<compile_context>
chip_gen: v5e
topology: v5e:2x2
jax: 0.10.0
libtpu: 0.0.40
codegen_flags: <defaults>
</compile_context>

<pallas_src>
import math
from functools import partial

import jax
import jax.numpy as jnp
from jax.experimental import pallas as pl
from jax.experimental.pallas import tpu as pltpu


_VMEM_LIMIT_BYTES = 48 * 1024 * 1024  # < v7x 64 MiB physical, > scoped defaults


# ------------------------------ kernels ------------------------------------

def _aam_label_kernel(out_ref, lbl_ref, o_ref, *, s_cos_m, s_sin_m, s_mm, th,
                      s, bc):
    """One-hot targets rebuilt in-kernel from per-row integer labels.

    s (the scale) is folded into the constants so the final blend is a single
    select with no trailing full-tile multiply.
    """
    j = pl.program_id(1)
    cosine = out_ref[...].astype(jnp.float32)
    bb, bw = cosine.shape

    # Fold the class-tile offset into the [bb,1] label (cheap) instead of
    # adding it to the full [bb,bw] iota (full-tile VALU op).
    lbl_local = lbl_ref[...] - j * bc                       # [bb, 1]
    col = jax.lax.broadcasted_iota(jnp.int32, (bb, bw), 1)  # [bb, bw]
    mask = col == lbl_local                                 # broadcast compare

    sc = s * cosine                                          # reused twice
    sine = jnp.sqrt(jnp.maximum(1.0 - cosine * cosine, 0.0))
    s_phi = cosine * s_cos_m - sine * s_sin_m                # == s * phi
    s_phi = jnp.where(cosine > th, s_phi, sc - s_mm)         # == s*(cos - mm)
    o_ref[...] = jnp.where(mask, s_phi, sc).astype(o_ref.dtype)


def _aam_dense_kernel(out_ref, tgt_ref, o_ref, *, cos_m, sin_m, th, mm, s):
    """Exact module semantics for an arbitrary (possibly soft) targets tensor."""
    cosine = out_ref[...].astype(jnp.float32)
    targets = tgt_ref[...].astype(jnp.float32)

    sine = jnp.sqrt(jnp.maximum(1.0 - cosine * cosine, 0.0))
    phi = cosine * cos_m - sine * sin_m
    phi = jnp.where(cosine > th, phi, cosine - mm)
    # targets*phi + (1-targets)*cosine  ==  cosine + targets*(phi - cosine)
    o_ref[...] = (s * (cosine + targets * (phi - cosine))).astype(o_ref.dtype)


# ------------------------------ helpers ------------------------------------

def _round_up(x, m):
    return ((x + m - 1) // m) * m


def _pick_tiles(B, C, block_b, block_c, *, max_bb, max_bc):
    """Lane-aligned, VMEM-budgeted tiles; guarantees >=2 grid blocks if possible."""
    if block_b is not None:
        if not (block_b == B or block_b % 8 == 0):
            raise ValueError("block_b must be a multiple of 8 or the full batch dim")
        bb = block_b
    else:
        bb = B if B <= max_bb else max_bb
    if block_c is not None:
        if not (block_c == C or block_c % 128 == 0):
            raise ValueError("block_c must be a multiple of 128 or the full class dim")
        bc = block_c
    else:
        bc = C if C <= max_bc else max_bc

    # v7x has 2 TensorCores: a (1,1) grid leaves one idle. Split the class dim
    # (keeps output lane-dense) or, failing that, the batch dim.
    if pl.cdiv(B, bb) * pl.cdiv(C, bc) == 1:
        if block_c is None and C >= 256:
            bc = _round_up(pl.cdiv(C, 2), 128)
        elif block_b is None and B >= 16:
            bb = _round_up(pl.cdiv(B, 2), 8)
    return bb, bc


def _consts(margin, scale):
    return dict(
        cos_m=math.cos(margin),
        sin_m=math.sin(margin),
        th=math.cos(math.pi - margin),
        mm=math.sin(math.pi - margin) * margin,
        s=float(scale),
    )


def _compiler_params():
    return pltpu.CompilerParams(
        dimension_semantics=("parallel", "parallel"),
        vmem_limit_bytes=_VMEM_LIMIT_BYTES,
    )


# ------------------------------ wrappers ------------------------------------

def additive_angular_margin_from_labels(outputs, labels, margin=0.2, scale=30.0,
                                        block_b=None, block_c=None,
                                        out_dtype=jnp.float32,
                                        donate_outputs=False):
    """Fast path: targets == one_hot(labels).

    Streams only the cosine matrix in and the result out (no dense one-hot).
    Pass bf16 `outputs` straight through and/or `out_dtype=jnp.bfloat16` to
    cut HBM traffic further (the latter changes the module's documented f32
    output precision, so it is opt-in). `donate_outputs=True` aliases the
    input buffer to the result (requires matching dtype).
    """
    B, C = outputs.shape
    assert labels.shape == (B,)
    # Label path: 2 f32 streams -> bc up to 4096 (2 x (8+8) MiB double-buffered).
    bb, bc = _pick_tiles(B, C, block_b, block_c, max_bb=512, max_bc=4096)
    c = _consts(margin, scale)
    kernel = partial(_aam_label_kernel, bc=bc, th=c["th"], s=c["s"],
                     s_cos_m=c["s"] * c["cos_m"], s_sin_m=c["s"] * c["sin_m"],
                     s_mm=c["s"] * c["mm"])
    lbl2d = labels.astype(jnp.int32).reshape(B, 1)
    grid = (pl.cdiv(B, bb), pl.cdiv(C, bc))  # class tiles innermost: label block reused

    aliases = {}
    if donate_outputs:
        if outputs.dtype != jnp.dtype(out_dtype):
            raise ValueError("donate_outputs requires outputs.dtype == out_dtype")
        aliases = {0: 0}

    return pl.pallas_call(
        kernel,
        out_shape=jax.ShapeDtypeStruct((B, C), out_dtype),
        grid=grid,
        in_specs=[
            pl.BlockSpec((bb, bc), lambda i, j: (i, j)),
            pl.BlockSpec((bb, 1), lambda i, j: (i, 0)),
        ],
        out_specs=pl.BlockSpec((bb, bc), lambda i, j: (i, j)),
        input_output_aliases=aliases,
        compiler_params=_compiler_params(),
    )(outputs, lbl2d)


def additive_angular_margin(outputs, targets, margin=0.2, scale=30.0,
                            block_b=None, block_c=None,
                            out_dtype=jnp.float32):
    """General path with dense targets [B, C] (exact module semantics, soft labels OK).

    Pass `targets` (and `outputs`) as bf16 to reduce read bandwidth; both are
    cast to f32 inside the kernel. Note bf16 targets are only bit-exact for
    hard one-hot labels; quantized soft labels deviate slightly.
    """
    B, C = outputs.shape
    assert targets.shape == (B, C)
    # Dense path: 3 streams -> bc up to 2048 (2 x (4+4+4) MiB double-buffered,
    # fits v5e's scoped default too even without the raised limit).
    bb, bc = _pick_tiles(B, C, block_b, block_c, max_bb=512, max_bc=2048)
    kernel = partial(_aam_dense_kernel, **_consts(margin, scale))
    grid = (pl.cdiv(B, bb), pl.cdiv(C, bc))
    return pl.pallas_call(
        kernel,
        out_shape=jax.ShapeDtypeStruct((B, C), out_dtype),
        grid=grid,
        in_specs=[
            pl.BlockSpec((bb, bc), lambda i, j: (i, j)),
            pl.BlockSpec((bb, bc), lambda i, j: (i, j)),
        ],
        out_specs=pl.BlockSpec((bb, bc), lambda i, j: (i, j)),
        compiler_params=_compiler_params(),
    )(outputs, targets)


# ------------------------------ reference -----------------------------------

def _aam_ref(outputs, targets, margin=0.2, scale=30.0):
    cosine = outputs.astype(jnp.float32)
    sine = jnp.sqrt(jnp.maximum(1.0 - cosine ** 2, 0.0))
    phi = cosine * math.cos(margin) - sine * math.sin(margin)
    phi = jnp.where(cosine > math.cos(math.pi - margin),
                    phi, cosine - math.sin(math.pi - margin) * margin)
    return scale * (targets * phi + (1.0 - targets) * cosine)


if __name__ == "__main__":
    key = jax.random.PRNGKey(0)
    k1, k2 = jax.random.split(key)

    B, C = 8, 512  # small, lane-aligned
    # "outputs" are cosine similarities in [-1, 1]
    outputs = jnp.tanh(jax.random.normal(k1, (B, C), dtype=jnp.float32))
    labels = jax.random.randint(k2, (B,), 0, C, dtype=jnp.int32)
    targets = jax.nn.one_hot(labels, C, dtype=jnp.float32)

    margin, scale = 0.2, 30.0
    want = _aam_ref(outputs, targets, margin=margin, scale=scale)

    # 1) label-based fast path, default tiles (grid auto-splits C for 2 TCs).
    got = additive_angular_margin_from_labels(outputs, labels,
                                              margin=margin, scale=scale)
    jax.block_until_ready(got)
    assert got.shape == (B, C) and got.dtype == jnp.float32
    assert jnp.allclose(got, want, atol=1e-4, rtol=1e-5), "label path mismatch"

    # 2) label-based path, explicit tiling (exercises the col-offset logic).
    got_tiled = additive_angular_margin_from_labels(
        outputs, labels, margin=margin, scale=scale, block_b=8, block_c=128)
    jax.block_until_ready(got_tiled)
    assert jnp.allclose(got_tiled, want, atol=1e-4, rtol=1e-5), "tiled label path mismatch"

    # 3) dense-targets path (exact module semantics).
    got_dense = additive_angular_margin(outputs, targets,
                                        margin=margin, scale=scale)
    jax.block_until_ready(got_dense)
    assert jnp.allclose(got_dense, want, atol=1e-5, rtol=1e-5), "dense path mismatch"

    # 4) opt-in bf16 output (traffic-reduction mode) -- looser tolerance.
    got_bf16 = additive_angular_margin_from_labels(
        outputs, labels, margin=margin, scale=scale, out_dtype=jnp.bfloat16)
    jax.block_until_ready(got_bf16)
    assert got_bf16.dtype == jnp.bfloat16
    assert jnp.allclose(got_bf16.astype(jnp.float32), want, atol=0.25), \
        "bf16-output path mismatch"

    # 5) opt-in input/output aliasing (label path, f32 in -> f32 out).
    got_alias = additive_angular_margin_from_labels(
        outputs, labels, margin=margin, scale=scale, donate_outputs=True)
    jax.block_until_ready(got_alias)
    assert jnp.allclose(got_alias, want, atol=1e-4, rtol=1e-5), "aliased path mismatch"

    print("KERNEL_OK")
</pallas_src>

<mosaic_0001>
module attributes {stable_mosaic.version = 11 : i64} {
  func.func @_aam_label_kernel(%arg0: i32, %arg1: i32, %arg2: memref<8x256xf32, #tpu.memory_space<vmem>>, %arg3: memref<8x1xi32, #tpu.memory_space<vmem>>, %arg4: memref<8x256xf32, #tpu.memory_space<vmem>>) attributes {dimension_semantics = [#tpu.dimension_semantics<parallel>, #tpu.dimension_semantics<parallel>], iteration_bounds = array<i64: 1, 2>, scalar_prefetch = 0 : i64, scratch_operands = 0 : i64, tpu.core_type = #tpu.core_type<tc>, window_params = [{transform_indices = @transform_0, window_bounds = array<i64: 8, 256>}, {transform_indices = @transform_1, window_bounds = array<i64: 8, 1>}, {transform_indices = @transform_2, window_bounds = array<i64: 8, 256>}]} {
    %c0 = arith.constant 0 : index
    %c0_0 = arith.constant 0 : index
    %0 = vector.load %arg2[%c0, %c0_0] : memref<8x256xf32, #tpu.memory_space<vmem>>, vector<8x256xf32>
    %c0_1 = arith.constant 0 : index
    %c0_2 = arith.constant 0 : index
    %1 = vector.load %arg3[%c0_1, %c0_2] : memref<8x1xi32, #tpu.memory_space<vmem>>, vector<8x1xi32>
    %c256_i32 = arith.constant 256 : i32
    %2 = arith.muli %arg1, %c256_i32 : i32
    %3 = vector.broadcast %2 : i32 to vector<8x1xi32>
    %4 = arith.subi %1, %3 : vector<8x1xi32>
    %5 = tpu.iota {dimensions = array<i32: 1>} : vector<8x256xi32>
    %6 = vector.broadcast %4 : vector<8x1xi32> to vector<8x256xi32>
    %7 = arith.cmpi eq, %5, %6 : vector<8x256xi32>
    %cst = arith.constant 3.000000e+01 : f32
    %8 = vector.broadcast %cst : f32 to vector<8x256xf32>
    %9 = arith.mulf %8, %0 : vector<8x256xf32>
    %10 = arith.mulf %0, %0 : vector<8x256xf32>
    %cst_3 = arith.constant 1.000000e+00 : f32
    %11 = vector.broadcast %cst_3 : f32 to vector<8x256xf32>
    %12 = arith.subf %11, %10 : vector<8x256xf32>
    %cst_4 = arith.constant 0.000000e+00 : f32
    %13 = vector.broadcast %cst_4 : f32 to vector<8x256xf32>
    %14 = arith.maximumf %12, %13 : vector<8x256xf32>
    %15 = math.sqrt %14 : vector<8x256xf32>
    %cst_5 = arith.constant 29.4019966 : f32
    %16 = vector.broadcast %cst_5 : f32 to vector<8x256xf32>
    %17 = arith.mulf %0, %16 : vector<8x256xf32>
    %cst_6 = arith.constant 5.960080e+00 : f32
    %18 = vector.broadcast %cst_6 : f32 to vector<8x256xf32>
    %19 = arith.mulf %15, %18 : vector<8x256xf32>
    %20 = arith.subf %17, %19 : vector<8x256xf32>
    %cst_7 = arith.constant -0.980066597 : f32
    %21 = vector.broadcast %cst_7 : f32 to vector<8x256xf32>
    %22 = arith.cmpf ogt, %0, %21 : vector<8x256xf32>
    %cst_8 = arith.constant 1.19201601 : f32
    %23 = vector.broadcast %cst_8 : f32 to vector<8x256xf32>
    %24 = arith.subf %9, %23 : vector<8x256xf32>
    %25 = arith.select %22, %20, %24 : vector<8x256xi1>, vector<8x256xf32>
    %26 = arith.select %7, %25, %9 : vector<8x256xi1>, vector<8x256xf32>
    %c0_9 = arith.constant 0 : index
    %c0_10 = arith.constant 0 : index
    %27 = vector.load %arg4[%c0_9, %c0_10] : memref<8x256xf32, #tpu.memory_space<vmem>>, vector<8x256xf32>
    tpu.vector_store %arg4[%c0_9, %c0_10], %26 {strides = array<i32>} : memref<8x256xf32, #tpu.memory_space<vmem>>, vector<8x256xf32>,
    return
  }
  func.func @transform_0(%arg0: i32, %arg1: i32) -> (i32, i32) {
    %c0_i32 = arith.constant 0 : i32
    return %arg0, %arg1 : i32, i32
  }
  func.func @transform_1(%arg0: i32, %arg1: i32) -> (i32, i32) {
    %c0_i32 = arith.constant 0 : i32
    %c0_i32_0 = arith.constant 0 : i32
    return %arg0, %c0_i32 : i32, i32
  }
  func.func @transform_2(%arg0: i32, %arg1: i32) -> (i32, i32) {
    %c0_i32 = arith.constant 0 : i32
    return %arg0, %arg1 : i32, i32
  }
}

</mosaic_0001>

<bundles_post_ra>
// kernel: tpu_custom_call.1
= control target key start
LH: loop header
LB: loop body
LE: loop exit
PB: predicated region body
PF: predicated region fallthrough
CT: control target
= control target key end

     0   :  { %7 = vsyncpa [#allocation3], 0  ;;  %s726_s0 = inlined_call_operand.hbm [shape: f32[8,512], index: 0, kind: input, shape index: {}]   ;;  %s727_s1 = inlined_call_operand.vmem [shape: s32[8,1], index: 1, kind: input, shape index: {}]   ;;  %s728_s2 = inlined_call_operand.hbm [shape: f32[8,512], index: 2, kind: output, shape index: {}]  }
   0x1   :  { %9 = vsyncpa [#allocation3 + $0x1], 0 }
   0x2   :  { %10 = vsyncpa [#allocation4], 0 }
   0x3   :  { %12 = vsyncpa [#allocation4 + $0x1], 0  ;;  %s598_s9 = smov 0   ;;  %s600_s10 = smov 0  }
   0x4   :  { %s602_s11 = smov 0   ;;  %s604_s12 = smov 0  }
   0x5   :  { %s606_s13 = smov 0   ;;  %s608_s14 = smov 0  }
   0x6 LB: > { %s379_s15 = sadd.s32 4294967295, %s580_s14   ;;  %s380_s16 = sadd.s32 4294967294, %s580_s14   ;;  %s580_s14 = sphi %s608_s14, %s18_s14   ;;  %s576_s13 = sphi %s606_s13, %s737_s13   ;;  %s572_s12 = sphi %s604_s12, %s736_s12   ;;  %s568_s11 = sphi %s602_s11, %s735_s11   ;;  %s564_s10 = sphi %s600_s10, %s734_s10   ;;  %s560_s9 = sphi %s598_s9, %s733_s9  }
   0x7   : > { %s27_s17 = sadd.s32 1, %s576_s13  ;;  %s39_s18 = sadd.s32 1, %s568_s11 }
   0x8   : > { %p28_p0 = scmp.ge.s32.totalorder %s27_s17, 2  ;;  %p46_p1 = scmp.ne.s32.totalorder %s568_s11, %s564_s10 }
   0x9   : > { %p47_p2 = scmp.eq.s32.totalorder %s580_s14, 0  ;;  %p52_p3 = scmp.ne.s32.totalorder %s564_s10, %s560_s9 }
   0xa   : > { %s739_s17 = smov (%p28_p0, %s27_s17), 0  ;;  %p53_p5 = scmp.eq.s32.totalorder %s379_s15, 0 }
   0xb   : > { %p639_p4 = por %p47_p2, %p46_p1  ;;  %s35_s20 = ssub.s32 %s576_s13, %s739_s17 }
   0xc   : > { %p104_p6 = scmp.eq.s32.totalorder %s379_s15, 1  ;;  %p37_p7 = scmp.eq.s32.totalorder %s35_s20, 0 }
   0xd   : > { %p645_p8 = por %p53_p5, %p52_p3  ;;  %p110_p10 = scmp.eq.s32.totalorder %s380_s16, 1 }
   0xe   : > { %p649_p9 = por %p104_p6, %p46_p1  ;;  %p383_p12 = scmp.ge.s32.totalorder %s580_s14, 2 }
   0xf   : > { %s654_s23 = scalar_select %p37_p7, %s568_s11, %s39_s18  }
  0x10   : > { %p656_p11 = por %p110_p10, %p52_p3  ;;  %p412_p13 = scmp.lt.s32.totalorder %s580_s14, 2 }
  0x11   : > { %s137_s25 = sand.u32 1, %s568_s11   ;;  %s398_s27 = sshll.u32 %s576_s13, 4 }
  0x12   : > { %s384_s26 = sshll.u32 %s137_s25, 4  ;;  %s148_s30 = scalar_lea.hbm %s726_s0, %s398_s27 }
  0x13   : > { %s141_s3 = scalar_lea.vmem [#allocation2], %s384_s26  ;;  %s150_s5 = sshll.u32 %s148_s30, 4  ;;  %s151_s5 = int_to_ptr.hbm [resolvable:$true] %s150_s5 }
  0x14   : > { %s152_s4 = sshll.u32 %s141_s3, 4  ;;  %p405_p0 = pnand %p412_p13, %p639_p4  ;;  %s153_s4 = int_to_ptr.vmem [resolvable:$true] %s152_s4 }
  0x15   : > { %p387_p1 = scmp.ge.s32.totalorder %s580_s14, 1  ;;  %p157_p2 = scmp.lt.s32.totalorder %s580_s14, 3 }
  0x16   : > { %s138_s6 = scalar_lea.sflag [#allocation3], %s137_s25 }
  0x17   : > { %407 = dma.hbm_to_vmem [thread:$0]  (!%p405_p0), %s151_s5, 256, %s153_s4, %s138_s6  }
  0x18   : > { %p158_p3 = pnand %p387_p1, %p157_p2 }
  0x19   : > { %s672_s7 = sand.u32 (!%p158_p3), 1, %s564_s10  }
  0x1a   : > { %161 = sbr.rel (%p158_p3) target bundleno = 157 (0x9d), region = 28  ;;  %s388_s8 = sshll.u32 (!%p158_p3), %s672_s7, 4 }
  0x1b   : > { %s164_s15 = scalar_lea.sflag (!%p158_p3), [#allocation3], %s672_s7  ;;  %s167_s16 = scalar_lea.vmem (!%p158_p3), [#allocation2], %s388_s8 }
  0x1f   : > { %551 = dma.done.wait (%p645_p8), %s164_s15, 256  }
  0x20   : > { %553 = vsyncadd (%p645_p8), %s164_s15, 4294967040  ;;  %v582_v0 = vmov 0   ;;  %s390_s18 = sshll.u32 %s572_s12, 8  ;;  %v201_v2 = vld [vmem:[%s727_s1] sm:$0xff]  ;;  %v200_v5 = vld [vmem:[%s167_s16 + $0x8] sm:$0xff]  ;;  %v205_v32 = vlaneseq  ;;  %s399_s21 = sshll.u32 %s572_s12, 4 }
  0x21   : > { %463 = vset.pattern.permute.xlu0 %v582_v0  ;;  %v203_v1 = vstv %s390_s18  ;;  %v199_v4 = vld [vmem:[%s167_s16] sm:$0xff]  ;;  %v216_v7 = vmul.f32 %v200_v5, %v200_v5  ;;  %v214_v34 = vmul.f32 30.0, %v200_v5  ;;  %v246_v36 = vmul.f32 29.401997, %v200_v5  ;;  %s275_s27 = scalar_lea.hbm %s728_s2, %s399_s21  ;;  %s192_s28 = scalar_lea.vmem [#allocation5], %s388_s8 }
  0x22   : > { %v204_v3 = vsub.s32 %v201_v2, %v203_v1  ;;  %v215_v6 = vmul.f32 %v199_v4, %v199_v4  ;;  %v213_v33 = vmul.f32 30.0, %v199_v4  ;;  %v245_v35 = vmul.f32 29.401997, %v199_v4  ;;  %s277_s29 = sshll.u32 %s192_s28, 4  ;;  %s279_s30 = sshll.u32 %s275_s27, 4  ;;  %s278_s29 = int_to_ptr.vmem [resolvable:$true] %s277_s29  ;;  %s280_s30 = int_to_ptr.hbm [resolvable:$true] %s279_s30 }
  0x23   : > { %v218_v9 = vsub.f32 1.0, %v216_v7  ;;  %v206_v39 = vand.u32 127, %v205_v32  ;;  %v392_v43 = vadd.f32 -1.192016, %v214_v34  ;;  %vm251_vm4 = vcmp.gt.f32.partialorder %v199_v4, -0.9800666 }
  0x24   : > { %209 = vperm.xlu0 %463, %v204_v3   ;;  %v217_v8 = vsub.f32 1.0, %v215_v6  ;;  %v391_v42 = vadd.f32 -1.192016, %v213_v33  ;;  %vm252_vm5 = vcmp.gt.f32.partialorder %v200_v5, -0.9800666  ;;  %s262_s12 = scalar_lea.sflag [#allocation4], %s672_s7 }
  0x25   : > { %v220_v11 = vmax.f32 %v218_v9, 0.0  ;;  %v207_v44 = vadd.s32 128, %v206_v39  ;;  %s512_s3 = sshra.s32 %s280_s30, 4  ;;  %s518_s8 = scalar_lea.hbm %s728_s2, 32  ;;  %s513_s3 = int_to_ptr.hbm [resolvable:$true] %s512_s3 }
  0x26   : > { %v219_v10 = vmax.f32 %v217_v8, 0.0  ;;  %s514_s4 = scalar_lea.hbm %s513_s3, 16  ;;  %p519_p7 = scmp.lt.s32.totalorder %s513_s3, %s728_s2 }
  0x27   : > { %vm240_vm1 = vcmp.eq.f32.partialorder %v220_v11, inf  ;;  %v243_v27 = vand.u32 2147483648, %v220_v11  ;;  %vm242_vm3 = vcmp.eq.f32.partialorder %v220_v11, 0.0  ;;  %p515_p4 = scmp.ne.s32.totalorder %s513_s3, %s514_s4  ;;  %p520_p8 = scmp.lt.s32.totalorder %s518_s8, %s514_s4 }
  0x28   : > { %464 = vrsqrt.f32 %v219_v10  ;;  %vm228_vm0 = vcmp.eq.f32.partialorder %v219_v10, inf  ;;  %v231_v26 = vand.u32 2147483648, %v219_v10  ;;  %vm230_vm2 = vcmp.eq.f32.partialorder %v219_v10, 0.0 }
  0x29   : > { %466 = vrsqrt.f32 %v220_v11  ;;  %p516_p5 = pnand %p515_p4, %p649_p9  ;;  %p521_p10 = por %p520_p8, %p519_p7 }
  0x2b   : > { %p517_p6 = pneg %p516_p5 }
  0x2d   : > { %p522_p13 = pnand %p521_p10, %p517_p6 }
  0x2e   : > { %v465_v12 = vpop.eup %464 }
  0x2f   : > { %v467_v13 = vpop.eup %466  ;;  %v222_v14 = vmul.f32 %v465_v12, %v219_v10 }
  0x30   : > { %v234_v15 = vmul.f32 %v467_v13, %v220_v11 }
  0x31   : > { %v223_v16 = vmul.f32 %v465_v12, %v222_v14 }
  0x32   : > { %v235_v17 = vmul.f32 %v467_v13, %v234_v15 }
  0x33   : > { %v224_v18 = vmul.f32 0.5, %v223_v16 }
  0x34   : > { %v236_v19 = vmul.f32 0.5, %v235_v17 }
  0x35   : > { %v225_v20 = vsub.f32 1.5, %v224_v18 }
  0x36   : > { %v237_v21 = vsub.f32 1.5, %v236_v19 }
  0x37   : > { %v226_v22 = vmul.f32 %v465_v12, %v225_v20 }
  0x38   : > { %v238_v23 = vmul.f32 %v467_v13, %v237_v21 }
  0x39   : > { %v227_v24 = vmul.f32 %v226_v22, %v219_v10 }
  0x3a   : > { %v239_v25 = vmul.f32 %v238_v23, %v220_v11 }
  0x3b   : > { %v229_v28 = vsel %vm228_vm0, %v219_v10, %v227_v24 }
  0x3c   : > { %v241_v29 = vsel %vm240_vm1, %v220_v11, %v239_v25  ;;  %v232_v30 = vsel %vm230_vm2, %v231_v26, %v229_v28 }
  0x3d   : > { %v244_v31 = vsel %vm242_vm3, %v243_v27, %v241_v29  ;;  %v247_v37 = vmul.f32 5.96008, %v232_v30 }
  0x3e   : > { %v248_v38 = vmul.f32 5.96008, %v244_v31 }
  0x3f   : > { %v249_v40 = vsub.f32 %v245_v35, %v247_v37 }
  0x40   : > { %v250_v41 = vsub.f32 %v246_v36, %v248_v38 }
  0x41   : > { %v255_v45 = vsel %vm251_vm4, %v249_v40, %v391_v42 }
  0x42   : > { %v256_v46 = vsel %vm252_vm5, %v250_v41, %v392_v43 }
  0x96   : > { %v210_v47 = vpop.permute.xlu0 %209 }
  0x97   : > { %vm211_vm6 = vcmp.eq.s32.totalorder %v206_v39, %v210_v47  ;;  %vm212_vm7 = vcmp.eq.s32.totalorder %v207_v44, %v210_v47 }
  0x98   : > { %v257_v48 = vsel %vm211_vm6, %v255_v45, %v213_v33  ;;  %v258_v49 = vsel %vm212_vm7, %v256_v46, %v214_v34 }
  0x99   : > { %259 = vst [vmem:[%s192_s28] sm:$0xff] %v257_v48 }
  0x9a   : > { %260 = vst [vmem:[%s192_s28 + $0x8] sm:$0xff] %v258_v49 }
  0x9b   : > { %525 = shalt.err (!%p522_p13)
}
  0x9c   : > { %402 = dma.vmem_to_hbm [thread:$0]  (%p649_p9), %s278_s29, 256, %s280_s30, %s262_s12  }
  0x9d PF: > { %s291_s7 = sand.u32 1, %s560_s9   ;;  %p409_p0 = pnand %p383_p12, %p656_p11 }
  0x9e   : > { %s292_s18 = scalar_lea.sflag [#allocation4], %s291_s7 }
  0x9f   : > { %p410_p1 = pneg %p409_p0 }
  0xa1   : > { %555 = dma.done.wait (%p410_p1), %s292_s18, 256  }
  0xa2   : > { %557 = vsyncadd (%p410_p1), %s292_s18, 4294967040  ;;  %s18_s14 = sadd.s32 1, %s580_s14   ;;  %s733_s9 = smov %s564_s10 }
  0xa3   : > { %p15_p2 = scmp.ge.s32.totalorder %s18_s14, 4   ;;  %s734_s10 = smov %s568_s11 }
  0xa4   : > { %s735_s11 = smov %s654_s23  ;;  %s736_s12 = smov %s576_s13 }
  0xa5   : > { %s737_s13 = smov %s739_s17  ;;  %17 = sbr.rel (!%p15_p2) target bundleno = 6 (0x6), region = 76 }
  0xaa   :  { %298 = vsyncpa [#allocation3], 1 }
  0xab   :  { %300 = vsyncpa [#allocation3 + $0x1], 1 }
  0xac   :  { %301 = vsyncpa [#allocation4], 1 }
  0xad   :  { %303 = vsyncpa [#allocation4 + $0x1], 1 }

</bundles_post_ra>
